<compile_context>
chip_gen: v7x
topology: tpu7x:2x2x1
jax: 0.10.0
libtpu: 0.0.40
codegen_flags: <defaults>
</compile_context>

<pallas_src>
import functools

import jax
import jax.numpy as jnp
from jax.experimental import pallas as pl
from jax.experimental.pallas import tpu as pltpu


# ----------------------------------------------------------------------------
# Pallas kernel: bottleneck 1x1-conv adapter on one (batch, pixel-tile) block
# ----------------------------------------------------------------------------
def _bottleneck_kernel(x_ref, w1t_ref, b1_ref, w2t_ref, b2_ref, o_ref, *, res):
    """o = W2^T @ relu(W1^T @ x + b1) + b2  (+ x if res), pixels on the lane dim.

    x_ref : (1, C_in, T)   native dtype (f32 or bf16)
    w1t   : (D, C_in)      same dtype as x
    b1    : (D, 1)         f32
    w2t   : (C_out, D)     same dtype as x
    b2    : (C_out, 1)     f32
    o_ref : (1, C_out, T)  same dtype as x
    """
    x = x_ref[0]                                                  # (C_in, T)
    h = jnp.dot(w1t_ref[...], x, preferred_element_type=jnp.float32)
    h = jnp.maximum(h + b1_ref[...], 0.0)                         # (D, T) f32
    y = jnp.dot(w2t_ref[...], h.astype(w2t_ref.dtype),
                preferred_element_type=jnp.float32)
    y = y + b2_ref[...]                                           # (C_out, T)
    if res:
        y = y + x.astype(jnp.float32)
    o_ref[0] = y.astype(o_ref.dtype)


def _pick_pixel_tile(HW, C_in, C_out, itemsize, vmem_budget=8 * 1024 * 1024):
    """Largest lane-dense pixel tile whose double-buffered in+out tiles fit the budget."""
    # bytes per pixel column: input tile + output tile, each double-buffered.
    per_px = 2 * (C_in + C_out) * itemsize
    cap = vmem_budget // max(per_px, 1)
    cap = (cap // 128) * 128
    cap = int(max(512, min(cap, 8192)))          # keep steps big, VMEM bounded
    # Full H*W block is always legal (block == full dim); otherwise the cap is
    # a multiple of 128 and pl.cdiv handles a ragged (padded) last block.
    return HW if HW <= cap else cap


# ----------------------------------------------------------------------------
# Wrapper: NCHW -> (B, C, H*W) (free reshape) + pallas_call
# ----------------------------------------------------------------------------
def adapter_forward(x_nchw, params, *, dim_adapter, res=False, hw_tile=None):
    """Forward pass of Adapter(type_adapter='singular', kernel_size=1, stride=1).

    x_nchw : (B, C_in, H, W) float32 or bfloat16
    params : dict with 'w1' (C_in, D), 'b1' (D,), 'w2' (D, C_out), 'b2' (C_out,)
             (ignored when dim_adapter == 0)
    hw_tile: optional pixel-tile override (multiple of 128); default = auto.
    """
    B, C_in, H, W = x_nchw.shape
    HW = H * W

    if dim_adapter == 0:
        # ZeroLayer path (stride == 1): no kernel launch, no HBM traffic.
        #   res=False -> zeros_like(x);  res=True -> x + 0 == x.
        return x_nchw if res else jnp.zeros_like(x_nchw)

    w1, b1, w2, b2 = params["w1"], params["b1"], params["w2"], params["b2"]
    D = w1.shape[1]
    C_out = w2.shape[1]
    if res:
        assert C_out == C_in, "residual requires out_ch == in_ch"

    cdt = x_nchw.dtype
    itemsize = jnp.dtype(cdt).itemsize

    if hw_tile is None:
        tile = _pick_pixel_tile(HW, C_in, C_out, itemsize)
    else:
        assert hw_tile % 128 == 0, "hw_tile must be a multiple of 128"
        tile = HW if HW <= hw_tile else hw_tile
    n_hw = pl.cdiv(HW, tile)

    # Native-layout view: channels on sublanes, pixels on lanes. No transpose.
    x_r = x_nchw.reshape(B, C_in, HW)

    # Weights in the input dtype (MXU-native for bf16), biases in f32 (column
    # vectors so they broadcast along the lane/pixel dim).
    w1t = jnp.asarray(w1).T.astype(cdt)                    # (D, C_in)
    w2t = jnp.asarray(w2).T.astype(cdt)                    # (C_out, D)
    b1c = jnp.asarray(b1).reshape(D, 1).astype(jnp.float32)
    b2c = jnp.asarray(b2).reshape(C_out, 1).astype(jnp.float32)

    out_r = pl.pallas_call(
        functools.partial(_bottleneck_kernel, res=res),
        out_shape=jax.ShapeDtypeStruct((B, C_out, HW), cdt),
        grid=(B, n_hw),
        in_specs=[
            pl.BlockSpec((1, C_in, tile), lambda b, j: (b, 0, j)),  # x tile
            pl.BlockSpec((D, C_in), lambda b, j: (0, 0)),           # W1^T (resident)
            pl.BlockSpec((D, 1), lambda b, j: (0, 0)),              # b1   (resident)
            pl.BlockSpec((C_out, D), lambda b, j: (0, 0)),          # W2^T (resident)
            pl.BlockSpec((C_out, 1), lambda b, j: (0, 0)),          # b2   (resident)
        ],
        out_specs=pl.BlockSpec((1, C_out, tile), lambda b, j: (b, 0, j)),
        compiler_params=pltpu.CompilerParams(
            dimension_semantics=("parallel", "parallel")),
    )(x_r, w1t, b1c, w2t, b2c)

    return out_r.reshape(B, C_out, H, W)


# ----------------------------------------------------------------------------
# Deterministic parameter init (matches Adapter.initialization: normal weights,
# zero bias) for the singular bottleneck path with kernel_size=1, groups=1.
# ----------------------------------------------------------------------------
def init_adapter_params(key, in_ch, dim_adapter, out_ch, mean=0.0, std=0.01):
    k1, k2 = jax.random.split(key)
    # Conv2d(in_ch, D, 1) weight is (D, C_in, 1, 1) in torch; stored here
    # transposed as (C_in, D) so the reference can do x_rows @ W1.
    w1 = mean + std * jax.random.normal(k1, (in_ch, dim_adapter), jnp.float32)
    b1 = jnp.zeros((dim_adapter,), jnp.float32)
    w2 = mean + std * jax.random.normal(k2, (dim_adapter, out_ch), jnp.float32)
    b2 = jnp.zeros((out_ch,), jnp.float32)
    return {"w1": w1, "b1": b1, "w2": w2, "b2": b2}


# Plain-JAX reference for correctness check.
def adapter_reference(x_nchw, params, *, dim_adapter, res=False):
    if dim_adapter == 0:
        return x_nchw if res else jnp.zeros_like(x_nchw)
    B, C, H, W = x_nchw.shape
    xr = jnp.transpose(x_nchw, (0, 2, 3, 1)).reshape(-1, C)
    h = jnp.maximum(xr @ params["w1"] + params["b1"][None, :], 0.0)
    y = h @ params["w2"] + params["b2"][None, :]
    if res:
        y = y + xr
    return jnp.transpose(y.reshape(B, H, W, -1), (0, 3, 1, 2))


# TODO(synk): attention / transformer / attention_singular adapter variants
# depend on external Attention/Transformer classes not provided here.

if __name__ == "__main__":
    key = jax.random.PRNGKey(0)
    kx, kp, kx2, kp2 = jax.random.split(key, 4)

    # Small, forward-consistent shapes: B=2, in_ch=out_ch=32, H=W=16, dim_adapter=8.
    B, C, H, W = 2, 32, 16, 16
    dim_adapter = 8
    x = jax.random.normal(kx, (B, C, H, W), jnp.float32)
    params = init_adapter_params(kp, in_ch=C, dim_adapter=dim_adapter, out_ch=C)

    # Bottleneck adapter with residual (res=True -> x + adapter(x)).
    out = adapter_forward(x, params, dim_adapter=dim_adapter, res=True)
    out = jax.block_until_ready(out)
    ref = adapter_reference(x, params, dim_adapter=dim_adapter, res=True)
    assert out.shape == (B, C, H, W)
    assert out.dtype == x.dtype
    assert jnp.allclose(out, ref, atol=1e-5, rtol=1e-5)

    # Non-residual bottleneck path.
    out_nr = jax.block_until_ready(
        adapter_forward(x, params, dim_adapter=dim_adapter, res=False))
    ref_nr = adapter_reference(x, params, dim_adapter=dim_adapter, res=False)
    assert jnp.allclose(out_nr, ref_nr, atol=1e-5, rtol=1e-5)

    # bf16 I/O path: dtype-preserving, looser tolerance.
    xb = x.astype(jnp.bfloat16)
    out_b = jax.block_until_ready(
        adapter_forward(xb, params, dim_adapter=dim_adapter, res=True))
    assert out_b.dtype == jnp.bfloat16
    ref_b = adapter_reference(xb.astype(jnp.float32), params,
                              dim_adapter=dim_adapter, res=True)
    assert jnp.allclose(out_b.astype(jnp.float32), ref_b, atol=5e-2, rtol=5e-2)

    # Small/odd channel counts (non 8-divisible C, C_out != C_in, no residual).
    B2, C2, H2, W2, D2, CO2 = 2, 4, 16, 16, 3, 6
    x2 = jax.random.normal(kx2, (B2, C2, H2, W2), jnp.float32)
    params2 = init_adapter_params(kp2, in_ch=C2, dim_adapter=D2, out_ch=CO2)
    out2 = jax.block_until_ready(
        adapter_forward(x2, params2, dim_adapter=D2, res=False))
    ref2 = adapter_reference(x2, params2, dim_adapter=D2, res=False)
    assert out2.shape == (B2, CO2, H2, W2)
    assert jnp.allclose(out2, ref2, atol=1e-5, rtol=1e-5)

    # Default-constructor path (ZeroLayer, stride=1): no kernel launch.
    out_zero = jax.block_until_ready(adapter_forward(x, None, dim_adapter=0, res=False))
    assert jnp.allclose(out_zero, jnp.zeros_like(x))
    out_id = jax.block_until_ready(adapter_forward(x, None, dim_adapter=0, res=True))
    assert jnp.allclose(out_id, x)

    print("KERNEL_OK")
</pallas_src>

<mosaic_0001>
module attributes {stable_mosaic.version = 11 : i64} {
  func.func @_bottleneck_kernel(%arg0: i32, %arg1: i32, %arg2: memref<1x32x256xf32, #tpu.memory_space<vmem>>, %arg3: memref<8x32xf32, #tpu.memory_space<vmem>>, %arg4: memref<8x1xf32, #tpu.memory_space<vmem>>, %arg5: memref<32x8xf32, #tpu.memory_space<vmem>>, %arg6: memref<32x1xf32, #tpu.memory_space<vmem>>, %arg7: memref<1x32x256xf32, #tpu.memory_space<vmem>>) attributes {dimension_semantics = [#tpu.dimension_semantics<parallel>, #tpu.dimension_semantics<parallel>], iteration_bounds = array<i64: 2, 1>, scalar_prefetch = 0 : i64, scratch_operands = 0 : i64, tpu.core_type = #tpu.core_type<tc>, window_params = [{transform_indices = @transform_0, window_bounds = array<i64: 1, 32, 256>}, {pipeline_mode = #tpu.pipeline_mode<synchronous>, transform_indices = @transform_1, window_bounds = array<i64: 8, 32>}, {pipeline_mode = #tpu.pipeline_mode<synchronous>, transform_indices = @transform_2, window_bounds = array<i64: 8, 1>}, {pipeline_mode = #tpu.pipeline_mode<synchronous>, transform_indices = @transform_3, window_bounds = array<i64: 32, 8>}, {pipeline_mode = #tpu.pipeline_mode<synchronous>, transform_indices = @transform_4, window_bounds = array<i64: 32, 1>}, {transform_indices = @transform_5, window_bounds = array<i64: 1, 32, 256>}]} {
    %c0 = arith.constant 0 : index
    %c0_0 = arith.constant 0 : index
    %c0_1 = arith.constant 0 : index
    %0 = vector.load %arg2[%c0, %c0_0, %c0_1] : memref<1x32x256xf32, #tpu.memory_space<vmem>>, vector<1x32x256xf32>
    %1 = vector.shape_cast %0 : vector<1x32x256xf32> to vector<32x256xf32>
    %c0_2 = arith.constant 0 : index
    %c0_3 = arith.constant 0 : index
    %2 = vector.load %arg3[%c0_2, %c0_3] : memref<8x32xf32, #tpu.memory_space<vmem>>, vector<8x32xf32>
    %cst = arith.constant dense<0.000000e+00> : vector<8x256xf32>
    %3 = tpu.matmul %2, %1, %cst {dimension_numbers = #tpu.dot_dimension_numbers<[1], [0], [0], [1], [0, 0, 1, 1], [], []>} : vector<8x32xf32>, vector<32x256xf32>, vector<8x256xf32> -> vector<8x256xf32>
    %c0_4 = arith.constant 0 : index
    %c0_5 = arith.constant 0 : index
    %4 = vector.load %arg4[%c0_4, %c0_5] : memref<8x1xf32, #tpu.memory_space<vmem>>, vector<8x1xf32>
    %5 = vector.broadcast %4 : vector<8x1xf32> to vector<8x256xf32>
    %6 = arith.addf %3, %5 : vector<8x256xf32>
    %cst_6 = arith.constant 0.000000e+00 : f32
    %7 = vector.broadcast %cst_6 : f32 to vector<8x256xf32>
    %8 = arith.maximumf %6, %7 : vector<8x256xf32>
    %c0_7 = arith.constant 0 : index
    %c0_8 = arith.constant 0 : index
    %9 = vector.load %arg5[%c0_7, %c0_8] : memref<32x8xf32, #tpu.memory_space<vmem>>, vector<32x8xf32>
    %cst_9 = arith.constant dense<0.000000e+00> : vector<32x256xf32>
    %10 = tpu.matmul %9, %8, %cst_9 {dimension_numbers = #tpu.dot_dimension_numbers<[1], [0], [0], [1], [0, 0, 1, 1], [], []>} : vector<32x8xf32>, vector<8x256xf32>, vector<32x256xf32> -> vector<32x256xf32>
    %c0_10 = arith.constant 0 : index
    %c0_11 = arith.constant 0 : index
    %11 = vector.load %arg6[%c0_10, %c0_11] : memref<32x1xf32, #tpu.memory_space<vmem>>, vector<32x1xf32>
    %12 = vector.broadcast %11 : vector<32x1xf32> to vector<32x256xf32>
    %13 = arith.addf %10, %12 : vector<32x256xf32>
    %14 = arith.addf %13, %1 : vector<32x256xf32>
    %c0_12 = arith.constant 0 : index
    %c0_13 = arith.constant 0 : index
    %c0_14 = arith.constant 0 : index
    %15 = vector.load %arg7[%c0_12, %c0_13, %c0_14] : memref<1x32x256xf32, #tpu.memory_space<vmem>>, vector<1x32x256xf32>
    %16 = vector.shape_cast %15 : vector<1x32x256xf32> to vector<32x256xf32>
    %17 = vector.shape_cast %14 : vector<32x256xf32> to vector<1x32x256xf32>
    tpu.vector_store %arg7[%c0_12, %c0_13, %c0_14], %17 {strides = array<i32>} : memref<1x32x256xf32, #tpu.memory_space<vmem>>, vector<1x32x256xf32>,
    return
  }
  func.func @transform_0(%arg0: i32, %arg1: i32) -> (i32, i32, i32) {
    %c0_i32 = arith.constant 0 : i32
    %c0_i32_0 = arith.constant 0 : i32
    return %arg0, %c0_i32, %arg1 : i32, i32, i32
  }
  func.func @transform_1(%arg0: i32, %arg1: i32) -> (i32, i32) {
    %c0_i32 = arith.constant 0 : i32
    %c0_i32_0 = arith.constant 0 : i32
    %c0_i32_1 = arith.constant 0 : i32
    return %c0_i32, %c0_i32_0 : i32, i32
  }
  func.func @transform_2(%arg0: i32, %arg1: i32) -> (i32, i32) {
    %c0_i32 = arith.constant 0 : i32
    %c0_i32_0 = arith.constant 0 : i32
    %c0_i32_1 = arith.constant 0 : i32
    return %c0_i32, %c0_i32_0 : i32, i32
  }
  func.func @transform_3(%arg0: i32, %arg1: i32) -> (i32, i32) {
    %c0_i32 = arith.constant 0 : i32
    %c0_i32_0 = arith.constant 0 : i32
    %c0_i32_1 = arith.constant 0 : i32
    return %c0_i32, %c0_i32_0 : i32, i32
  }
  func.func @transform_4(%arg0: i32, %arg1: i32) -> (i32, i32) {
    %c0_i32 = arith.constant 0 : i32
    %c0_i32_0 = arith.constant 0 : i32
    %c0_i32_1 = arith.constant 0 : i32
    return %c0_i32, %c0_i32_0 : i32, i32
  }
  func.func @transform_5(%arg0: i32, %arg1: i32) -> (i32, i32, i32) {
    %c0_i32 = arith.constant 0 : i32
    %c0_i32_0 = arith.constant 0 : i32
    return %arg0, %c0_i32, %arg1 : i32, i32, i32
  }
}

</mosaic_0001>

<bundles_post_ra>
// kernel: tpu_custom_call.1
= control target key start
LH: loop header
LB: loop body
LE: loop exit
PB: predicated region body
PF: predicated region fallthrough
CT: control target
= control target key end

     0   :  { %10 = vsyncpa [#allocation3], 0  ;;  %s1096_s0 = inlined_call_operand.hbm [shape: f32[2,32,256], index: 0, kind: input, shape index: {}]   ;;  %s1097_s1 = inlined_call_operand.vmem [shape: f32[8,32], index: 1, kind: input, shape index: {}]   ;;  %s1098_s2 = inlined_call_operand.vmem [shape: f32[8,1], index: 2, kind: input, shape index: {}]   ;;  %s1099_s3 = inlined_call_operand.vmem [shape: f32[32,8], index: 3, kind: input, shape index: {}]   ;;  %s1100_s4 = inlined_call_operand.vmem [shape: f32[32,1], index: 4, kind: input, shape index: {}]   ;;  %s1101_s5 = inlined_call_operand.hbm [shape: f32[2,32,256], index: 5, kind: output, shape index: {}]  }
   0x1   :  { %12 = vsyncpa [#allocation3 + $0x1], 0 }
   0x2   :  { %13 = vsyncpa [#allocation4], 0 }
   0x3   :  { %15 = vsyncpa [#allocation4 + $0x1], 0  ;;  %s856_s18 = smov 0   ;;  %s858_s19 = smov 0  }
   0x4   :  { %s860_s20 = smov 0   ;;  %s862_s21 = smov 0  }
   0x5   :  { %s864_s22 = smov 0   ;;  %s866_s23 = smov 0  }
   0x6 LB: > { %s604_s24 = sadd.s32 4294967295, %s816_s23   ;;  %s605_s25 = sadd.s32 4294967294, %s816_s23   ;;  %s816_s23 = sphi %s866_s23, %s21_s23   ;;  %s812_s22 = sphi %s864_s22, %s1116_s22   ;;  %s808_s21 = sphi %s862_s21, %s1115_s21   ;;  %s804_s20 = sphi %s860_s20, %s1114_s20   ;;  %s800_s19 = sphi %s858_s19, %s1113_s19   ;;  %s796_s18 = sphi %s856_s18, %s1112_s18  }
   0x7   : > { %s33_s26 = sadd.s32 1, %s812_s22  ;;  %s42_s27 = sadd.s32 1, %s804_s20 }
   0x8   : > { %p35_p0 = scmp.ge.s32.totalorder %s33_s26, 2  ;;  %p49_p1 = scmp.ne.s32.totalorder %s804_s20, %s800_s19 }
   0x9   : > { %p50_p2 = scmp.eq.s32.totalorder %s816_s23, 0  ;;  %p55_p3 = scmp.ne.s32.totalorder %s800_s19, %s796_s18 }
   0xa   : > { %s1118_s26 = smov (%p35_p0, %s33_s26), 0  ;;  %p56_p5 = scmp.eq.s32.totalorder %s604_s24, 0 }
   0xb   : > { %p897_p4 = por %p50_p2, %p49_p1  ;;  %s37_s29 = ssub.s32 %s812_s22, %s1118_s26 }
   0xc   : > { %p165_p6 = scmp.eq.s32.totalorder %s604_s24, 1  ;;  %p40_p7 = scmp.eq.s32.totalorder %s37_s29, 0 }
   0xd   : > { %p903_p8 = por %p56_p5, %p55_p3  ;;  %p171_p10 = scmp.eq.s32.totalorder %s605_s25, 1 }
   0xe   : > { %p907_p9 = por %p165_p6, %p49_p1  ;;  %p646_p13 = scmp.lt.s32.totalorder %s816_s23, 2 }
   0xf   : > { %s912_s7 = scalar_select %p40_p7, %s804_s20, %s42_s27  }
  0x10   : > { %s1105_s6 = scalar_select %p907_p9, 1, 0 }
  0x11   : > { %p914_p11 = por %p171_p10, %p55_p3  ;;  %s203_s9 = sand.u32 1, %s804_s20  }
  0x12   : > { %s608_s10 = sshll.u32 %s203_s9, 6  ;;  %s624_s11 = sshll.u32 %s812_s22, 10 }
  0x13   : > { %s1106_s8 = scalar_select %p914_p11, 1, 0 }
  0x14   : > { %s925_s14 = scalar_lea.hbm %s1096_s0, %s624_s11  ;;  %s207_s15 = scalar_lea.vmem [#allocation2], %s608_s10 }
  0x15   : > { %s216_s16 = sshll.u32 %s207_s15, 4  ;;  %p931_p0 = pnand %p646_p13, %p897_p4  ;;  %s927_s16 = int_to_ptr.vmem [resolvable:$true] %s216_s16 }
  0x16   : > { %s936_s24 = scalar_lea.sflag [#allocation3], %s203_s9  ;;  %s704_s25 = scalar_lea.hbm %s925_s14, 1024 }
  0x17   : > { %p705_p2 = scmp.ne.s32.totalorder %s925_s14, %s704_s25  ;;  %p706_p3 = pneg %p931_p0 }
  0x18   : > { %s709_s28 = scalar_lea.hbm %s1096_s0, 2048  ;;  %p710_p4 = scmp.lt.u32.totalorder %s925_s14, %s1096_s0 }
  0x19   : > { %p707_p5 = pnand %p706_p3, %p705_p2  ;;  %p711_p7 = scmp.lt.u32.totalorder %s709_s28, %s704_s25 }
  0x1a   : > { %p713_p13 = scmp.lt.u32.totalorder %s704_s25, %s925_s14 }
  0x1b   : > { %p708_p6 = pneg %p707_p5  ;;  %p712_p10 = por %p711_p7, %p710_p4 }
  0x1d   : > { %p714_p12 = por %p713_p13, %p712_p10 }
  0x1f   : > { %p715_p1 = pnand %p714_p12, %p708_p6 }
  0x21   : > { %718 = shalt.err (!%p715_p1)
}
  0x22   : > { %s719_s9 = scalar_lea.vmem %s927_s16, 1024  ;;  %s818_s12 = smov [#allocation2]  }
  0x23   : > { %p720_p2 = scmp.ne.s32.totalorder %s927_s16, %s719_s9  ;;  %s724_s13 = sshll.u32 %s818_s12, 4  ;;  %s725_s13 = int_to_ptr.vmem [resolvable:$false] %s724_s13 }
  0x24   : > { %s726_s15 = scalar_lea.vmem %s725_s13, 2048  ;;  %p727_p9 = scmp.lt.s32.totalorder %s927_s16, %s725_s13 }
  0x25   : > { %p722_p5 = pnand %p720_p2, %p706_p3  ;;  %p728_p4 = scmp.lt.s32.totalorder %s726_s15, %s719_s9 }
  0x27   : > { %p723_p11 = pneg %p722_p5  ;;  %p729_p7 = por %p728_p4, %p727_p9 }
  0x29   : > { %p730_p10 = pnand %p729_p7, %p723_p11 }
  0x2b   : > { %733 = shalt.err (!%p730_p10)
}
  0x2c   : > { %s819_s25 = smov 256   ;;  %s820_s27 = smov 16  }
  0x2d   : > { %641 = dma.hbm_to_vmem [thread:$0]  (!%p931_p0), %s925_s14, 1024, %s927_s16, %s936_s24, %s819_s25, %s819_s25, %s820_s27  }
  0x2e   : > { %p224_p12 = scmp.lt.s32.totalorder %s816_s23, 3  ;;  %p1108_p1 = scmp.ge.s32.totalorder %s816_s23, 1 }
  0x30   : > { %p225_p3 = pnand %p1108_p1, %p224_p12 }
  0x31   : > { %s968_s29 = sand.u32 (!%p225_p3), 1, %s800_s19  }
  0x32   : > { %228 = sbr.rel (%p225_p3) target bundleno = 532 (0x214), region = 40  ;;  %s612_s28 = sshll.u32 (!%p225_p3), %s968_s29, 6 }
  0x33   : > { %s231_s10 = scalar_lea.sflag (!%p225_p3), [#allocation3], %s968_s29  ;;  %s234_s11 = scalar_lea.vmem (!%p225_p3), [#allocation2], %s612_s28 }
  0x39   : > { %787 = dma.done.wait (%p903_p8), %s231_s10, 1024  }
  0x3a   : > { %789 = vsyncadd (%p903_p8), %s231_s10, 4294966272  ;;  %v821_v0 = vmov 0.0   ;;  %v822_v1 = vmov 0   ;;  %v264_v2 = vld [vmem:[%s234_s11 + $0x8] sm:$0xff]  ;;  %v978_v3 = vld [vmem:[%s234_s11 + $0x18] sm:$0xff]  ;;  %vm278_vm0 = vcmask 261120  }
  0x3b   : > { %346 = vmatprep.mubr.f32.mxu0 %v821_v0  ;;  %702 = vset.pattern.permute.xlu0 %v822_v1  ;;  %v263_v4 = vld [vmem:[%s234_s11] sm:$0xff]  ;;  %v626_v5 = vpack.c.bf16 %v978_v3, %v264_v2  ;;  %v265_v6 = vld [vmem:[%s234_s11 + $0x10] sm:$0xff]  ;;  %v981_v7 = vld [vmem:[%s234_s11 + $0x28] sm:$0xff]  ;;  %vm383_vm1 = vcmask 64512   ;;  %s1025_s13 = scalar_lea.vmem [#allocation5], %s612_s28  ;;  %s625_s15 = sshll.u32 %s808_s21, 10 }
  0x3c   : > { %460 = vmatprep.mubr.f32.mxu1 %v821_v0  ;;  %703 = vset.pattern.permute.xlu1 %v822_v1  ;;  %v983_v8 = vld [vmem:[%s234_s11 + $0x38] sm:$0xff]  ;;  %v628_v9 = vpack.c.bf16 %v265_v6, %v263_v4  ;;  %v987_v11 = vld [vmem:[%s234_s11 + $0x20] sm:$0xff]  ;;  %v989_v12 = vld [vmem:[%s234_s11 + $0x30] sm:$0xff]  ;;  %s517_s28 = sshll.u32 %s1025_s13, 4  ;;  %s1044_s10 = scalar_lea.hbm %s1101_s5, %s625_s15  ;;  %s1037_s28 = int_to_ptr.vmem [resolvable:$true] %s517_s28 }
  0x3d   : > { %v630_v10 = vpack.c.bf16 %v983_v8, %v981_v7  ;;  %627 = vmatprep.subr.bf16.mxu0 %v626_v5  ;;  %v272_v13 = vld [vmem:[%s1098_s2] sm:$0xff]  ;;  %v632_v14 = vpack.c.bf16 %v989_v12, %v987_v11  ;;  %v362_v17 = vld [vmem:[%s1100_s4 + $0x18] sm:$0xff]  ;;  %v360_v18 = vld [vmem:[%s1100_s4 + $0x8] sm:$0xff]  ;;  %s502_s21 = scalar_lea.sflag [#allocation4], %s968_s29  ;;  %s734_s11 = scalar_lea.vmem %s1037_s28, 1024 }
  0x3e   : > { %629 = vmatpush1.bf16.msra.mxu0 %v628_v9  ;;  %275 = vperm.xlu0 %702, %v272_v13   ;;  %v359_v15 = vld [vmem:[%s1100_s4] sm:$0xff]  ;;  %v361_v19 = vld [vmem:[%s1100_s4 + $0x10] sm:$0xff]  ;;  %v356_v28 = vld [vmem:[%s1099_s3 + $0x8] sm:$0xff]  ;;  %p735_p8 = scmp.ne.s32.totalorder %s1037_s28, %s734_s11  ;;  %p1109_p9 = scmp.ne.s32.totalorder %s1105_s6, 0 }
  0x3f   : > { %631 = vmatprep.subr.bf16.mxu0 %v630_v10  ;;  %v271_v16 = vld [vmem:[%s1097_s1] sm:$0xff]  ;;  %370 = vperm.xlu1 %703, %v360_v18   ;;  %v357_v29 = vld [vmem:[%s1099_s3 + $0x10] sm:$0xff]  ;;  %v358_v30 = vld [vmem:[%s1099_s3 + $0x18] sm:$0xff]  ;;  %s823_s30 = smov [#allocation5]  }
  0x40   : > { %v355_v27 = vld [vmem:[%s1099_s3] sm:$0xff]  ;;  %p736_p11 = pnand %p735_p8, %p1109_p9  ;;  %s738_s14 = sshll.u32 %s823_s30, 4  ;;  %s739_s14 = int_to_ptr.vmem [resolvable:$false] %s738_s14 }
  0x41   : > { %s740_s16 = scalar_lea.vmem %s739_s14, 2048  ;;  %p741_p6 = scmp.lt.s32.totalorder %s1037_s28, %s739_s14 }
  0x42   : > { %633 = vmatpush1.bf16.msra.mxu0 %v632_v14  ;;  %365 = vperm.xlu0 %702, %v359_v15   ;;  %p737_p0 = pneg %p736_p11  ;;  %p742_p13 = scmp.lt.s32.totalorder %s740_s16, %s734_s11 }
  0x43   : > { %375 = vperm.xlu1 %703, %v361_v19  }
  0x44   : > { %p743_p2 = por %p742_p13, %p741_p6 }
  0x45   : > { %614 = vmatmul.mubr.msk.f32.vlgmr.msra.gmra.mrb[0].mxu0 %vm278_vm0, %v271_v16 }
  0x46   : > { %380 = vperm.xlu0 %702, %v362_v17   ;;  %p744_p5 = pnand %p743_p2, %p737_p0 }
  0xbd   : > { %v276_v20 = vpop.permute.xlu0 %275 }
  0xbe   : > { %v371_v33 = vpop.permute.xlu1 %370 }
  0xc1   : > { %v366_v31 = vpop.permute.xlu0 %365 }
  0xc2   : > { %v376_v43 = vpop.permute.xlu1 %375 }
  0xc5   : > { %v381_v51 = vpop.permute.xlu0 %380 }
 0x118   : > { %v348_v21 = vpop.f32.mrb[0].mxu0 }
 0x119   : > { %v349_v22 = vadd.f32 %v348_v21, %v276_v20  ;;  %v350_v23 = vpop.f32.mrb[1].mxu0 }
 0x11a   : > { %v351_v24 = vadd.f32 %v350_v23, %v276_v20 }
 0x11b   : > { %v353_v26 = vmax.f32 %v349_v22, 0.0 }
 0x11c   : > { %v354_v25 = vmax.f32 %v351_v24, 0.0 }
 0x11e   : > { %396 = vmatprep.subr.mxu1 %v354_v25 }
 0x11f   : > { %397 = vmatpush1.msra.mxu1 %v353_v26 }
 0x120   : > { %615 = vmatmul.mubr.msk.f32.vlgmr.msra.gmra.mrb[0].mxu1 %vm383_vm1, %v355_v27 }
 0x121   : > { %466 = vmatprep.mubr.f32.mxu1 %v821_v0 }
 0x124   : > { %616 = vmatmul.mubr.msk.f32.gmra.mrb[2].mxu1 %vm383_vm1, %v356_v28 }
 0x125   : > { %472 = vmatprep.mubr.f32.mxu1 %v821_v0 }
 0x128   : > { %617 = vmatmul.mubr.msk.f32.gmra.mrb[4].mxu1 %vm383_vm1, %v357_v29 }
 0x129   : > { %478 = vmatprep.mubr.f32.mxu1 %v821_v0 }
 0x12c   : > { %618 = vmatmul.mubr.msk.f32.gmra.mrb[6].mxu1 %vm383_vm1, %v358_v30 }
 0x1f3   : > { %v462_v32 = vpop.f32.mrb[0].mxu1 }
 0x1f4   : > { %v463_v34 = vadd.f32 %v462_v32, %v366_v31  ;;  %v464_v35 = vpop.f32.mrb[1].mxu1 }
 0x1f5   : > { %v465_v36 = vadd.f32 %v464_v35, %v366_v31 }
 0x1f6   : > { %v485_v37 = vadd.f32 %v463_v34, %v263_v4 }
 0x1f7   : > { %v486_v38 = vadd.f32 %v465_v36, %v264_v2  ;;  %v468_v39 = vpop.f32.mrb[2].mxu1 }
 0x1f8   : > { %493 = vst [vmem:[%s1025_s13] sm:$0xff] %v485_v37  ;;  %v469_v40 = vadd.f32 %v468_v39, %v371_v33  ;;  %v470_v41 = vpop.f32.mrb[3].mxu1 }
 0x1f9   : > { %494 = vst [vmem:[%s1025_s13 + $0x8] sm:$0xff] %v486_v38  ;;  %v471_v42 = vadd.f32 %v470_v41, %v371_v33 }
 0x1fa   : > { %v487_v44 = vadd.f32 %v469_v40, %v265_v6 }
 0x1fb   : > { %v488_v45 = vadd.f32 %v471_v42, %v978_v3  ;;  %v474_v46 = vpop.f32.mrb[4].mxu1 }
 0x1fc   : > { %495 = vst [vmem:[%s1025_s13 + $0x10] sm:$0xff] %v487_v44  ;;  %v475_v47 = vadd.f32 %v474_v46, %v376_v43  ;;  %v476_v48 = vpop.f32.mrb[5].mxu1 }
 0x1fd   : > { %496 = vst [vmem:[%s1025_s13 + $0x18] sm:$0xff] %v488_v45  ;;  %v477_v49 = vadd.f32 %v476_v48, %v376_v43 }
 0x1fe   : > { %v489_v50 = vadd.f32 %v475_v47, %v987_v11 }
 0x1ff   : > { %v490_v52 = vadd.f32 %v477_v49, %v981_v7  ;;  %v480_v53 = vpop.f32.mrb[6].mxu1 }
 0x200   : > { %497 = vst [vmem:[%s1025_s13 + $0x20] sm:$0xff] %v489_v50  ;;  %v481_v54 = vadd.f32 %v480_v53, %v381_v51  ;;  %v482_v55 = vpop.f32.mrb[7].mxu1 }
 0x201   : > { %498 = vst [vmem:[%s1025_s13 + $0x28] sm:$0xff] %v490_v52  ;;  %v483_v56 = vadd.f32 %v482_v55, %v381_v51 }
 0x202   : > { %v491_v57 = vadd.f32 %v481_v54, %v989_v12 }
 0x203   : > { %v492_v58 = vadd.f32 %v483_v56, %v983_v8 }
 0x204   : > { %499 = vst [vmem:[%s1025_s13 + $0x30] sm:$0xff] %v491_v57 }
 0x205   : > { %500 = vst [vmem:[%s1025_s13 + $0x38] sm:$0xff] %v492_v58 }
 0x206   : > { %747 = shalt.err (!%p744_p5)
}
 0x207   : > { %s748_s17 = scalar_lea.hbm %s1044_s10, 1024  ;;  %s752_s12 = scalar_lea.hbm %s1101_s5, 2048 }
 0x208   : > { %p749_p4 = scmp.ne.s32.totalorder %s1044_s10, %s748_s17  ;;  %p753_p12 = scmp.lt.u32.totalorder %s1044_s10, %s1101_s5 }
 0x209   : > { %p754_p1 = scmp.lt.u32.totalorder %s752_s12, %s748_s17  ;;  %p756_p8 = scmp.lt.u32.totalorder %s748_s17, %s1044_s10 }
 0x20a   : > { %p750_p7 = pnand %p749_p4, %p1109_p9 }
 0x20b   : > { %p755_p3 = por %p754_p1, %p753_p12 }
 0x20c   : > { %p751_p10 = pneg %p750_p7 }
 0x20d   : > { %p757_p11 = por %p756_p8, %p755_p3 }
 0x20f   : > { %p758_p0 = pnand %p757_p11, %p751_p10 }
 0x211   : > { %761 = shalt.err (!%p758_p0)
}
 0x212   : > { %s824_s25 = smov 256   ;;  %s825_s27 = smov 16  }
 0x213   : > { %636 = dma.vmem_to_hbm [thread:$0]  (%p1109_p9), %s1037_s28, 1024, %s1044_s10, %s502_s21, %s824_s25, %s824_s25, %s825_s27  }
 0x214 PF: > { %s532_s11 = sand.u32 1, %s796_s18   ;;  %p1110_p6 = scmp.ne.s32.totalorder %s1106_s8, 0 }
 0x215   : > { %p1111_p13 = scmp.ge.s32.totalorder %s816_s23, 2  ;;  %s533_s30 = scalar_lea.sflag [#allocation4], %s532_s11 }
 0x217   : > { %p643_p2 = pnand %p1111_p13, %p1110_p6 }
 0x219   : > { %791 = dma.done.wait (!%p643_p2), %s533_s30, 1024  }
 0x21a   : > { %793 = vsyncadd (!%p643_p2), %s533_s30, 4294966272  ;;  %s21_s23 = sadd.s32 1, %s816_s23   ;;  %s1112_s18 = smov %s800_s19 }
 0x21b   : > { %p18_p5 = scmp.ge.s32.totalorder %s21_s23, 4   ;;  %s1113_s19 = smov %s804_s20 }
 0x21c   : > { %s1114_s20 = smov %s912_s7  ;;  %s1115_s21 = smov %s812_s22 }
 0x21d   : > { %s1116_s22 = smov %s1118_s26  ;;  %20 = sbr.rel (!%p18_p5) target bundleno = 6 (0x6), region = 85 }
 0x224   :  { %538 = vsyncpa [#allocation3], 1 }
 0x225   :  { %540 = vsyncpa [#allocation3 + $0x1], 1 }
 0x226   :  { %541 = vsyncpa [#allocation4], 1 }
 0x227   :  { %543 = vsyncpa [#allocation4 + $0x1], 1 }

</bundles_post_ra>
